<compile_context>
chip_gen: v6e
topology: v6e:2x2x1
jax: 0.10.0
libtpu: 0.0.40
codegen_flags: <defaults>
</compile_context>

<pallas_src>
import jax
import jax.numpy as jnp
from jax.experimental import pallas as pl
from jax.experimental.pallas import tpu as pltpu


def _cross_stitch_kernel(w_ref, x_ref, o_ref):
    # w_ref: (T, T, c_blk, 1) f32 cross-stitch weights (grid-invariant, resident)
    # x_ref: (T, c_blk, m_blk) stacked task-feature tile
    # o_ref: (T, c_blk, m_blk) stacked output tile
    n_tasks = x_ref.shape[0]
    # Load each task's tile once; reuse across all T outputs.
    xs = [x_ref[j].astype(jnp.float32) for j in range(n_tasks)]
    for i in range(n_tasks):
        acc = xs[0] * w_ref[i, 0]                 # (c_blk, m_blk) * (c_blk, 1)
        for j in range(1, n_tasks):
            acc = acc + xs[j] * w_ref[i, j]
        o_ref[i] = acc.astype(o_ref.dtype)


def _choose_tiles(c, m):
    """Pick (c_blk, m_blk): full dims when small, (8,128)-aligned when large.

    Caps keep double-buffered in/out blocks a few MiB at most, safe for the
    v5e 16 MiB scoped default and v7x's 64 MiB physical VMEM.
    """
    m_blk = m
    for cand in (512, 256, 128):
        if m > cand and m % cand == 0:
            m_blk = cand
            break
    c_blk = c
    for cand in (256, 128, 64, 32, 16, 8):
        if c > cand and c % cand == 0:
            c_blk = cand
            break
    return c_blk, m_blk


def cross_stitch_unit(task_feature, params, tasks):
    """Fused forward of CrossStitch_Unit.

    task_feature: {task: (N, C, L) array}
    params:       {task_i: {task_j: (C,) array}}
    Returns {task_i: (N, C, L)} with out_i = sum_j params[i][j][None,:,None] * x_j.
    """
    xs = [task_feature[t] for t in tasks]
    n, c, l = xs[0].shape
    t_num = len(tasks)
    dtype = xs[0].dtype
    m = n * l

    # Layout plumbing (XLA side): channels -> sublanes, batch*length -> lanes.
    x = jnp.stack([jnp.transpose(xi, (1, 0, 2)).reshape(c, m) for xi in xs])  # (T, C, M)
    w = jnp.stack([jnp.stack([params[ti][tj] for tj in tasks]) for ti in tasks])
    w = w.astype(jnp.float32).reshape(t_num, t_num, c, 1)                     # (T, T, C, 1)

    c_blk, m_blk = _choose_tiles(c, m)
    grid = (c // c_blk, m // m_blk)

    out = pl.pallas_call(
        _cross_stitch_kernel,
        out_shape=jax.ShapeDtypeStruct((t_num, c, m), dtype),
        grid_spec=pltpu.PrefetchScalarGridSpec(
            num_scalar_prefetch=0,
            grid=grid,
            in_specs=[
                # Weights: constant index_map -> kept resident, never re-DMA'd.
                pl.BlockSpec((t_num, t_num, c_blk, 1), lambda ci, mi: (0, 0, ci, 0)),
                # Stacked features: tile (channels, lanes).
                pl.BlockSpec((t_num, c_blk, m_blk), lambda ci, mi: (0, ci, mi)),
            ],
            out_specs=pl.BlockSpec((t_num, c_blk, m_blk), lambda ci, mi: (0, ci, mi)),
        ),
        compiler_params=pltpu.CompilerParams(
            dimension_semantics=("parallel", "parallel"),
        ),
    )(w, x)

    # Back to the PyTorch (N, C, L) layout per task.
    return {
        t: jnp.transpose(out[i].reshape(c, n, l), (1, 0, 2))
        for i, t in enumerate(tasks)
    }


def channel_wise_mul(param, x):
    """param: (C,), x: (N, C, L) -> param.view(1, C, 1) * x  (T=1 cross-stitch)."""
    return cross_stitch_unit({"x": x}, {"x": {"x": param}}, ["x"])["x"]


# TODO(synk): CrossStitch_Model's per-task backbones (forward_stage /
# forward_tower) and the loss/accuracy helpers are not specified, so only the
# cross-stitch exchange (the Pallas-translatable core) is implemented here.


if __name__ == "__main__":
    key = jax.random.PRNGKey(0)
    tasks = ["RL", "Recons", "Motif"]
    N, C, L = 2, 4, 16
    alpha, beta = 0.9, 0.1

    feat_keys = jax.random.split(key, len(tasks))
    task_feature = {
        t: jax.random.normal(k, (N, C, L), dtype=jnp.float32)
        for t, k in zip(tasks, feat_keys)
    }

    # Cross-stitch params: the module's _weight_init_ fills alpha on the
    # diagonal and beta off-diagonal; add a small deterministic per-channel
    # offset so the per-channel broadcast path is actually exercised.
    params = {}
    for i, ti in enumerate(tasks):
        params[ti] = {}
        for j, tj in enumerate(tasks):
            base = alpha if ti == tj else beta
            params[ti][tj] = base + 0.01 * (i * len(tasks) + j + 1) * jnp.arange(
                C, dtype=jnp.float32
            )

    out = cross_stitch_unit(task_feature, params, tasks)
    out = jax.block_until_ready(out)

    # Reference (plain JAX) = CrossStitch_Unit.forward semantics.
    ref = {}
    for ti in tasks:
        acc = jnp.zeros((N, C, L), dtype=jnp.float32)
        for tj in tasks:
            acc = acc + params[ti][tj].reshape(1, C, 1) * task_feature[tj]
        ref[ti] = acc

    for t in tasks:
        assert out[t].shape == (N, C, L)
        assert jnp.allclose(out[t], ref[t], atol=1e-5, rtol=1e-5), t

    # Also check the T=1 channel_wise_mul path.
    p = jnp.arange(1, C + 1, dtype=jnp.float32) * 0.5
    y = jax.block_until_ready(channel_wise_mul(p, task_feature["RL"]))
    assert jnp.allclose(y, p.reshape(1, C, 1) * task_feature["RL"], atol=1e-5, rtol=1e-5)

    print("KERNEL_OK")
</pallas_src>

<mosaic_0001>
module attributes {stable_mosaic.version = 11 : i64} {
  func.func @_cross_stitch_kernel(%arg0: i32, %arg1: i32, %arg2: memref<3x3x4x1xf32, #tpu.memory_space<vmem>>, %arg3: memref<3x4x32xf32, #tpu.memory_space<vmem>>, %arg4: memref<3x4x32xf32, #tpu.memory_space<vmem>>) attributes {dimension_semantics = [#tpu.dimension_semantics<parallel>, #tpu.dimension_semantics<parallel>], iteration_bounds = array<i64: 1, 1>, scalar_prefetch = 0 : i64, scratch_operands = 0 : i64, tpu.core_type = #tpu.core_type<tc>, window_params = [{transform_indices = @transform_0, window_bounds = array<i64: 3, 3, 4, 1>}, {transform_indices = @transform_1, window_bounds = array<i64: 3, 4, 32>}, {transform_indices = @transform_2, window_bounds = array<i64: 3, 4, 32>}]} {
    %c0 = arith.constant 0 : index
    %c0_0 = arith.constant 0 : index
    %c0_1 = arith.constant 0 : index
    %0 = vector.load %arg3[%c0, %c0_0, %c0_1] : memref<3x4x32xf32, #tpu.memory_space<vmem>>, vector<1x4x32xf32>
    %1 = vector.shape_cast %0 : vector<1x4x32xf32> to vector<4x32xf32>
    %c1 = arith.constant 1 : index
    %c0_2 = arith.constant 0 : index
    %c0_3 = arith.constant 0 : index
    %2 = vector.load %arg3[%c1, %c0_2, %c0_3] : memref<3x4x32xf32, #tpu.memory_space<vmem>>, vector<1x4x32xf32>
    %3 = vector.shape_cast %2 : vector<1x4x32xf32> to vector<4x32xf32>
    %c2 = arith.constant 2 : index
    %c0_4 = arith.constant 0 : index
    %c0_5 = arith.constant 0 : index
    %4 = vector.load %arg3[%c2, %c0_4, %c0_5] : memref<3x4x32xf32, #tpu.memory_space<vmem>>, vector<1x4x32xf32>
    %5 = vector.shape_cast %4 : vector<1x4x32xf32> to vector<4x32xf32>
    %c0_6 = arith.constant 0 : index
    %c0_7 = arith.constant 0 : index
    %c0_8 = arith.constant 0 : index
    %c0_9 = arith.constant 0 : index
    %6 = vector.load %arg2[%c0_6, %c0_7, %c0_8, %c0_9] : memref<3x3x4x1xf32, #tpu.memory_space<vmem>>, vector<1x1x4x1xf32>
    %7 = vector.shape_cast %6 : vector<1x1x4x1xf32> to vector<4x1xf32>
    %8 = vector.broadcast %7 : vector<4x1xf32> to vector<4x32xf32>
    %9 = arith.mulf %1, %8 : vector<4x32xf32>
    %c0_10 = arith.constant 0 : index
    %c1_11 = arith.constant 1 : index
    %c0_12 = arith.constant 0 : index
    %c0_13 = arith.constant 0 : index
    %10 = vector.load %arg2[%c0_10, %c1_11, %c0_12, %c0_13] : memref<3x3x4x1xf32, #tpu.memory_space<vmem>>, vector<1x1x4x1xf32>
    %11 = vector.shape_cast %10 : vector<1x1x4x1xf32> to vector<4x1xf32>
    %12 = vector.broadcast %11 : vector<4x1xf32> to vector<4x32xf32>
    %13 = arith.mulf %3, %12 : vector<4x32xf32>
    %14 = arith.addf %9, %13 : vector<4x32xf32>
    %c0_14 = arith.constant 0 : index
    %c2_15 = arith.constant 2 : index
    %c0_16 = arith.constant 0 : index
    %c0_17 = arith.constant 0 : index
    %15 = vector.load %arg2[%c0_14, %c2_15, %c0_16, %c0_17] : memref<3x3x4x1xf32, #tpu.memory_space<vmem>>, vector<1x1x4x1xf32>
    %16 = vector.shape_cast %15 : vector<1x1x4x1xf32> to vector<4x1xf32>
    %17 = vector.broadcast %16 : vector<4x1xf32> to vector<4x32xf32>
    %18 = arith.mulf %5, %17 : vector<4x32xf32>
    %19 = arith.addf %14, %18 : vector<4x32xf32>
    %c0_18 = arith.constant 0 : index
    %c0_19 = arith.constant 0 : index
    %c0_20 = arith.constant 0 : index
    %20 = vector.load %arg4[%c0_18, %c0_19, %c0_20] : memref<3x4x32xf32, #tpu.memory_space<vmem>>, vector<1x4x32xf32>
    %21 = vector.shape_cast %20 : vector<1x4x32xf32> to vector<4x32xf32>
    %22 = vector.shape_cast %19 : vector<4x32xf32> to vector<1x4x32xf32>
    tpu.vector_store %arg4[%c0_18, %c0_19, %c0_20], %22 {strides = array<i32>} : memref<3x4x32xf32, #tpu.memory_space<vmem>>, vector<1x4x32xf32>,
    %c1_21 = arith.constant 1 : index
    %c0_22 = arith.constant 0 : index
    %c0_23 = arith.constant 0 : index
    %c0_24 = arith.constant 0 : index
    %23 = vector.load %arg2[%c1_21, %c0_22, %c0_23, %c0_24] : memref<3x3x4x1xf32, #tpu.memory_space<vmem>>, vector<1x1x4x1xf32>
    %24 = vector.shape_cast %23 : vector<1x1x4x1xf32> to vector<4x1xf32>
    %25 = vector.broadcast %24 : vector<4x1xf32> to vector<4x32xf32>
    %26 = arith.mulf %1, %25 : vector<4x32xf32>
    %c1_25 = arith.constant 1 : index
    %c1_26 = arith.constant 1 : index
    %c0_27 = arith.constant 0 : index
    %c0_28 = arith.constant 0 : index
    %27 = vector.load %arg2[%c1_25, %c1_26, %c0_27, %c0_28] : memref<3x3x4x1xf32, #tpu.memory_space<vmem>>, vector<1x1x4x1xf32>
    %28 = vector.shape_cast %27 : vector<1x1x4x1xf32> to vector<4x1xf32>
    %29 = vector.broadcast %28 : vector<4x1xf32> to vector<4x32xf32>
    %30 = arith.mulf %3, %29 : vector<4x32xf32>
    %31 = arith.addf %26, %30 : vector<4x32xf32>
    %c1_29 = arith.constant 1 : index
    %c2_30 = arith.constant 2 : index
    %c0_31 = arith.constant 0 : index
    %c0_32 = arith.constant 0 : index
    %32 = vector.load %arg2[%c1_29, %c2_30, %c0_31, %c0_32] : memref<3x3x4x1xf32, #tpu.memory_space<vmem>>, vector<1x1x4x1xf32>
    %33 = vector.shape_cast %32 : vector<1x1x4x1xf32> to vector<4x1xf32>
    %34 = vector.broadcast %33 : vector<4x1xf32> to vector<4x32xf32>
    %35 = arith.mulf %5, %34 : vector<4x32xf32>
    %36 = arith.addf %31, %35 : vector<4x32xf32>
    %c1_33 = arith.constant 1 : index
    %c0_34 = arith.constant 0 : index
    %c0_35 = arith.constant 0 : index
    %37 = vector.load %arg4[%c1_33, %c0_34, %c0_35] : memref<3x4x32xf32, #tpu.memory_space<vmem>>, vector<1x4x32xf32>
    %38 = vector.shape_cast %37 : vector<1x4x32xf32> to vector<4x32xf32>
    %39 = vector.shape_cast %36 : vector<4x32xf32> to vector<1x4x32xf32>
    tpu.vector_store %arg4[%c1_33, %c0_34, %c0_35], %39 {strides = array<i32>} : memref<3x4x32xf32, #tpu.memory_space<vmem>>, vector<1x4x32xf32>,
    %c2_36 = arith.constant 2 : index
    %c0_37 = arith.constant 0 : index
    %c0_38 = arith.constant 0 : index
    %c0_39 = arith.constant 0 : index
    %40 = vector.load %arg2[%c2_36, %c0_37, %c0_38, %c0_39] : memref<3x3x4x1xf32, #tpu.memory_space<vmem>>, vector<1x1x4x1xf32>
    %41 = vector.shape_cast %40 : vector<1x1x4x1xf32> to vector<4x1xf32>
    %42 = vector.broadcast %41 : vector<4x1xf32> to vector<4x32xf32>
    %43 = arith.mulf %1, %42 : vector<4x32xf32>
    %c2_40 = arith.constant 2 : index
    %c1_41 = arith.constant 1 : index
    %c0_42 = arith.constant 0 : index
    %c0_43 = arith.constant 0 : index
    %44 = vector.load %arg2[%c2_40, %c1_41, %c0_42, %c0_43] : memref<3x3x4x1xf32, #tpu.memory_space<vmem>>, vector<1x1x4x1xf32>
    %45 = vector.shape_cast %44 : vector<1x1x4x1xf32> to vector<4x1xf32>
    %46 = vector.broadcast %45 : vector<4x1xf32> to vector<4x32xf32>
    %47 = arith.mulf %3, %46 : vector<4x32xf32>
    %48 = arith.addf %43, %47 : vector<4x32xf32>
    %c2_44 = arith.constant 2 : index
    %c2_45 = arith.constant 2 : index
    %c0_46 = arith.constant 0 : index
    %c0_47 = arith.constant 0 : index
    %49 = vector.load %arg2[%c2_44, %c2_45, %c0_46, %c0_47] : memref<3x3x4x1xf32, #tpu.memory_space<vmem>>, vector<1x1x4x1xf32>
    %50 = vector.shape_cast %49 : vector<1x1x4x1xf32> to vector<4x1xf32>
    %51 = vector.broadcast %50 : vector<4x1xf32> to vector<4x32xf32>
    %52 = arith.mulf %5, %51 : vector<4x32xf32>
    %53 = arith.addf %48, %52 : vector<4x32xf32>
    %c2_48 = arith.constant 2 : index
    %c0_49 = arith.constant 0 : index
    %c0_50 = arith.constant 0 : index
    %54 = vector.load %arg4[%c2_48, %c0_49, %c0_50] : memref<3x4x32xf32, #tpu.memory_space<vmem>>, vector<1x4x32xf32>
    %55 = vector.shape_cast %54 : vector<1x4x32xf32> to vector<4x32xf32>
    %56 = vector.shape_cast %53 : vector<4x32xf32> to vector<1x4x32xf32>
    tpu.vector_store %arg4[%c2_48, %c0_49, %c0_50], %56 {strides = array<i32>} : memref<3x4x32xf32, #tpu.memory_space<vmem>>, vector<1x4x32xf32>,
    return
  }
  func.func @transform_0(%arg0: i32, %arg1: i32) -> (i32, i32, i32, i32) {
    %c0_i32 = arith.constant 0 : i32
    %c0_i32_0 = arith.constant 0 : i32
    %c0_i32_1 = arith.constant 0 : i32
    %c0_i32_2 = arith.constant 0 : i32
    return %c0_i32, %c0_i32_0, %arg0, %c0_i32_1 : i32, i32, i32, i32
  }
  func.func @transform_1(%arg0: i32, %arg1: i32) -> (i32, i32, i32) {
    %c0_i32 = arith.constant 0 : i32
    %c0_i32_0 = arith.constant 0 : i32
    return %c0_i32, %arg0, %arg1 : i32, i32, i32
  }
  func.func @transform_2(%arg0: i32, %arg1: i32) -> (i32, i32, i32) {
    %c0_i32 = arith.constant 0 : i32
    %c0_i32_0 = arith.constant 0 : i32
    return %c0_i32, %arg0, %arg1 : i32, i32, i32
  }
}

</mosaic_0001>

<bundles_post_ra>
// kernel: tpu_custom_call.1
= control target key start
LH: loop header
LB: loop body
LE: loop exit
PB: predicated region body
PF: predicated region fallthrough
CT: control target
= control target key end

     0   :  { %v154_v2 = vmov 0   ;;  %s212_s0 = inlined_call_operand.vmem [shape: f32[3,3,4,1], index: 0, kind: input, shape index: {}]   ;;  %s213_s1 = inlined_call_operand.vmem [shape: f32[3,4,32], index: 1, kind: input, shape index: {}]   ;;  %s214_s2 = inlined_call_operand.hbm [shape: f32[3,4,32], index: 2, kind: output, shape index: {}]  }
   0x1   :  { %v120_v0 = vld [vmem:[%s212_s0 + $0xc] sm:$0xf]  ;;  %v17_v1 = vld [vmem:[%s212_s0] sm:$0xf]  ;;  %131 = vset.pattern.permute.xlu1 %v154_v2  ;;  %130 = vset.pattern.permute.xlu0 %v154_v2  ;;  %v121_v3 = vld [vmem:[%s212_s0 + $0x10] sm:$0xf] }
   0x2   :  { %48 = vperm.xlu1 %131, %v120_v0   ;;  %20 = vperm.xlu0 %130, %v17_v1   ;;  %v118_v4 = vld [vmem:[%s212_s0 + $0x4] sm:$0xf] }
   0x3   :  { %7 = vsyncpa [#allocation3], 0  ;;  %v124_v5 = vld [vmem:[%s212_s0 + $0x1c] sm:$0xf]  ;;  %v123_v6 = vld [vmem:[%s212_s0 + $0x18] sm:$0xf] }
   0x4   :  { %v122_v7 = vld [vmem:[%s212_s0 + $0x14] sm:$0xf]  ;;  %v119_v8 = vld [vmem:[%s212_s0 + $0x8] sm:$0xf]  ;;  %v125_v9 = vld [vmem:[%s212_s0 + $0x20] sm:$0xf] }
   0x5   :  { %v116_v14 = vld [vmem:[%s213_s1 + $0x4] sm:$0xf]  ;;  %v12_v15 = vld [vmem:[%s213_s1] sm:$0xf]  ;;  %v117_v22 = vld [vmem:[%s213_s1 + $0x8] sm:$0xf] }
   0x6   :  { %56 = vperm.xlu1 %131, %v121_v3   ;;  %28 = vperm.xlu0 %130, %v118_v4   ;;  %vm42_vm0 = vcmask 257024   ;;  %s155_s4 = smov [#allocation2]  }
   0x7   :  { %s105_s5 = sshll.u32 %s155_s4, 4  ;;  %s106_s5 = int_to_ptr.vmem [resolvable:$true] %s105_s5 }
   0x8   :  { %s132_s1 = scalar_lea.vmem %s106_s5, 192  ;;  %p137_p1 = scmp.lt.s32.totalorder %s106_s5, %s106_s5 }
   0x9   :  { %p133_p0 = scmp.ne.s32.totalorder %s106_s5, %s132_s1  ;;  %p138_p2 = scmp.lt.s32.totalorder %s132_s1, %s132_s1 }
   0xa   :  { %84 = vperm.xlu1 %131, %v124_v5   ;;  %76 = vperm.xlu0 %130, %v123_v6  }
   0xb   :  { %p139_p3 = por %p138_p2, %p137_p1 }
   0xd   :  { %p140_p4 = pnand %p139_p3, %p133_p0 }
   0xe   :  { %65 = vperm.xlu1 %131, %v122_v7   ;;  %37 = vperm.xlu0 %130, %v119_v8  }
  0x12   :  { %93 = vperm.xlu0 %130, %v125_v9  }
  0x7d   :  { %v49_v10 = vpop.permute.xlu1 %48  ;;  %v21_v11 = vpop.permute.xlu0 %20 }
  0x7e   :  { %v51_v16 = vmul.f32 %v49_v10, %v12_v15  ;;  %v23_v21 = vmul.f32 %v21_v11, %v12_v15 }
  0x81   :  { %v57_v12 = vpop.permute.xlu1 %56  ;;  %v29_v13 = vpop.permute.xlu0 %28 }
  0x82   :  { %v59_v17 = vmul.f32 %v116_v14, %v57_v12  ;;  %v31_v18 = vmul.f32 %v116_v14, %v29_v13 }
  0x84   :  { %v60_v23 = vadd.f32 %v59_v17, %v51_v16  ;;  %v32_v24 = vadd.f32 %v31_v18, %v23_v21 }
  0x85   :  { %v85_v19 = vpop.permute.xlu1 %84  ;;  %v77_v20 = vpop.permute.xlu0 %76 }
  0x86   :  { %v87_v27 = vmul.f32 %v116_v14, %v85_v19  ;;  %v79_v28 = vmul.f32 %v77_v20, %v12_v15 }
  0x88   :  { %v88_v34 = vadd.f32 %v87_v27, %v79_v28 }
  0x89   :  { %v66_v25 = vpop.permute.xlu1 %65  ;;  %v38_v26 = vpop.permute.xlu0 %37 }
  0x8a   :  { %v68_v29 = vmul.f32 %v117_v22, %v66_v25  ;;  %v40_v30 = vmul.f32 %v117_v22, %v38_v26 }
  0x8c   :  { %v69_v31 = vadd.f32 %v68_v29, %v60_v23  ;;  %v41_v32 = vadd.f32 %v40_v30, %v32_v24 }
  0x8d   :  { %v94_v33 = vpop.permute.xlu0 %93 }
  0x8e   :  { %71 = vst.msk [vmem:[#allocation2 + $0x4] sm:$0xf] %vm42_vm0, %v69_v31  ;;  %43 = vst.msk [vmem:[#allocation2] sm:$0xf] %vm42_vm0, %v41_v32  ;;  %v96_v35 = vmul.f32 %v117_v22, %v94_v33 }
  0x90   :  { %v97_v36 = vadd.f32 %v96_v35, %v88_v34 }
  0x92   :  { %99 = vst.msk [vmem:[#allocation2 + $0x8] sm:$0xf] %vm42_vm0, %v97_v36 }
  0x93   :  { %143 = shalt.err (!%p140_p4)
}
  0x94   :  { %s156_s6 = smov 64   ;;  %s157_s7 = smov 4  }
  0x95   :  { %111 = dma.vmem_to_hbm [thread:$0]  %s106_s5, 192, %s214_s2, [#allocation3], %s156_s6, %s156_s6, %s157_s7  }
  0x96   :  { %152 = dma.done.wait [#allocation3], 192  }
  0x97   :  { %153 = vsyncadd [#allocation3], 4294967104 }
  0x98   :  { %115 = vsyncpa [#allocation3], 1 }

</bundles_post_ra>
